<compile_context>
chip_gen: v7x
topology: tpu7x:2x2x1
jax: 0.10.0
libtpu: 0.0.40
codegen_flags: <defaults>
</compile_context>

<pallas_src>
import functools

import jax
import jax.numpy as jnp
from jax import lax
from jax.experimental import pallas as pl
from jax.experimental.pallas import tpu as pltpu


def _wce_kernel(x_ref, t_ref, o_ref, *, w0, w1, valid_rows, tile_rows):
    """One grid step processes `tile_rows` packed rows of 128 samples each.

    x_ref : (2, T, 128) float  class-major logits; x_ref[c][r, l] is the class-c
                               logit of sample (block_row r, lane l).
    t_ref : (T, 128)    int8   compact targets (one per sample).
    o_ref : (8, 128)    f32    per-step partial sums (row 0 holds column sums).
    """
    x0 = x_ref[0].astype(jnp.float32)              # (T, 128) class-0 logits
    x1 = x_ref[1].astype(jnp.float32)              # (T, 128) class-1 logits
    t = t_ref[...].astype(jnp.int32)               # (T, 128)

    # Binary-softmax identity: -log_softmax(x)[t] = softplus(x[1-t] - x[t]).
    # |x[1-t] - x[t]| == |z| for both classes, so exp/log1p run ONCE per sample.
    z = x1 - x0
    is1 = t == 1
    zt = jnp.where(is1, -z, z)                     # x_other - x_target
    sp = jnp.maximum(zt, 0.0) + jnp.log1p(jnp.exp(-jnp.abs(z)))
    w = jnp.where(is1, jnp.float32(w1), jnp.float32(w0))

    # In-kernel tail masking: rows at/after `valid_rows` belong to a ragged
    # final block and may contain undefined data — zero their contribution.
    row = pl.program_id(0) * tile_rows + lax.broadcasted_iota(
        jnp.int32, (tile_rows, 1), 0)
    contrib = jnp.where(row < valid_rows, w * sp, 0.0)        # (T, 128)

    # Lane-wise partial sums; write a full, unmasked lane-dense (8, 128) block
    # with the column sums in sublane 0.
    colsum = jnp.sum(contrib, axis=0, keepdims=True)          # (1, 128)
    sub = lax.broadcasted_iota(jnp.int32, (8, 128), 0)
    o_ref[...] = jnp.where(sub == 0, colsum, 0.0)


def _tail_sum(logits, target, w0, w1):
    """Plain-JAX sum of w[t] * softplus(x[1-t] - x[t]) for a tiny ragged tail."""
    x = logits.astype(jnp.float32)
    z = x[:, 1] - x[:, 0]
    is1 = target == 1
    zt = jnp.where(is1, -z, z)
    sp = jnp.maximum(zt, 0.0) + jnp.log1p(jnp.exp(-jnp.abs(z)))
    w = jnp.where(is1, jnp.float32(w1), jnp.float32(w0))
    return jnp.sum(w * sp)


def weighted_cross_entropy_loss(logits, target, *, weight, loss_weight=1.0,
                                tile_rows=4096):
    """logits: (N, 2) float, target: (N,) int; `weight` is the module's init arg."""
    n, c = logits.shape
    if c != 2:
        raise ValueError("WeightedCrossEntropyLoss expects binary logits (C == 2)")
    w0 = float(1.0 / (1.0 + weight))
    w1 = float(weight / (1.0 + weight))

    # "Main" part: a multiple of 4096 samples == a multiple of 32 packed rows of
    # 128 samples, so blocks stay aligned to f32 (8,128), bf16 (16,128) and
    # int8 (32,128) native tilings with no wrapper-side padding pass.
    n_main = (n // 4096) * 4096
    total = jnp.float32(0.0)

    if n_main:
        rp = n_main // 128                         # packed sample rows (mult of 32)
        tr = max(32, min(int(tile_rows), rp))
        tr -= tr % 32                              # multiple of 32, <= rp
        grid = pl.cdiv(rp, tr)                     # last block may be ragged (masked)

        # Single layout pass: slice + transpose + free reshape -> class-major
        # lane-dense logits. Logits keep their HBM dtype (bf16 stays bf16).
        xp = jnp.swapaxes(logits[:n_main], 0, 1).reshape(2, rp, 128)
        # Targets streamed compactly as int8: 1 byte/sample, no repeat/widen.
        tp = target[:n_main].astype(jnp.int8).reshape(rp, 128)

        kernel = functools.partial(_wce_kernel, w0=w0, w1=w1,
                                   valid_rows=rp, tile_rows=tr)
        partials = pl.pallas_call(
            kernel,
            out_shape=jax.ShapeDtypeStruct((grid * 8, 128), jnp.float32),
            grid_spec=pltpu.PrefetchScalarGridSpec(
                num_scalar_prefetch=0,
                grid=(grid,),
                in_specs=[
                    pl.BlockSpec((2, tr, 128), lambda i: (0, i, 0)),   # logits
                    pl.BlockSpec((tr, 128), lambda i: (i, 0)),         # targets
                ],
                out_specs=pl.BlockSpec((8, 128), lambda i: (i, 0)),    # partials
            ),
            compiler_params=pltpu.CompilerParams(
                dimension_semantics=("parallel",),    # independent steps -> megacore
                vmem_limit_bytes=48 * 1024 * 1024,    # safe on v5e/v6e/v7x
            ),
        )(xp, tp)
        total = total + jnp.sum(partials)

    if n_main < n:
        # Ragged tail (< 4096 samples): negligible traffic, plain JAX.
        total = total + _tail_sum(logits[n_main:], target[n_main:], w0, w1)

    loss = total / jnp.float32(n)
    return (jnp.float32(loss_weight) * loss).astype(jnp.float32)


def _reference(logits, target, weight):
    w = jnp.array([1.0 / (1.0 + weight), weight / (1.0 + weight)], jnp.float32)
    x = logits.astype(jnp.float32)
    log_probs = jax.nn.log_softmax(x, axis=1)
    one_hot = jax.nn.one_hot(target, x.shape[1], dtype=jnp.float32)
    return jnp.sum(-log_probs * one_hot * w[None, :]) / x.shape[0]


if __name__ == "__main__":
    weight = 2.0          # module __init__ argument
    loss_weight = 1.0

    key = jax.random.PRNGKey(0)
    k1, k2, k3, k4, k5, k6 = jax.random.split(key, 6)
    C = 2

    # 1) Aligned case: kernel-only path (no tail), single grid step.
    N1 = 4096
    logits1 = jax.random.normal(k1, (N1, C), dtype=jnp.float32)
    target1 = jax.random.randint(k2, (N1,), 0, C, dtype=jnp.int32)
    loss1 = weighted_cross_entropy_loss(logits1, target1, weight=weight,
                                        loss_weight=loss_weight)
    jax.block_until_ready(loss1)
    ref1 = loss_weight * _reference(logits1, target1, weight)
    assert jnp.allclose(loss1, ref1, rtol=1e-5, atol=1e-5), (loss1, ref1)

    # 2) Ragged case: multi-step grid, ragged (masked) last block, JAX tail.
    N2 = 12988            # main = 12288 samples (96 rows), tail = 700 samples
    logits2 = jax.random.normal(k3, (N2, C), dtype=jnp.float32)
    target2 = jax.random.randint(k4, (N2,), 0, C, dtype=jnp.int32)
    loss2 = weighted_cross_entropy_loss(logits2, target2, weight=weight,
                                        loss_weight=loss_weight, tile_rows=64)
    jax.block_until_ready(loss2)
    ref2 = loss_weight * _reference(logits2, target2, weight)
    assert jnp.allclose(loss2, ref2, rtol=1e-5, atol=1e-5), (loss2, ref2)

    # 3) bf16 logits streamed over HBM in their native dtype.
    N3 = 8192
    logits3 = jax.random.normal(k5, (N3, C), dtype=jnp.bfloat16)
    target3 = jax.random.randint(k6, (N3,), 0, C, dtype=jnp.int32)
    loss3 = weighted_cross_entropy_loss(logits3, target3, weight=weight,
                                        loss_weight=loss_weight)
    jax.block_until_ready(loss3)
    ref3 = loss_weight * _reference(logits3, target3, weight)
    assert jnp.allclose(loss3, ref3, rtol=1e-4, atol=1e-4), (loss3, ref3)

    print("KERNEL_OK")
</pallas_src>

<mosaic_0001>
module attributes {stable_mosaic.version = 11 : i64} {
  func.func @_wce_kernel(%arg0: i32, %arg1: memref<2x32x128xf32, #tpu.memory_space<vmem>>, %arg2: memref<32x128xi8, #tpu.memory_space<vmem>>, %arg3: memref<8x128xf32, #tpu.memory_space<vmem>>) attributes {dimension_semantics = [#tpu.dimension_semantics<parallel>], iteration_bounds = array<i64: 1>, scalar_prefetch = 0 : i64, scratch_operands = 0 : i64, tpu.core_type = #tpu.core_type<tc>, window_params = [{transform_indices = @transform_0, window_bounds = array<i64: 2, 32, 128>}, {transform_indices = @transform_1, window_bounds = array<i64: 32, 128>}, {transform_indices = @transform_2, window_bounds = array<i64: 8, 128>}]} {
    %c0 = arith.constant 0 : index
    %c0_0 = arith.constant 0 : index
    %c0_1 = arith.constant 0 : index
    %0 = vector.load %arg1[%c0, %c0_0, %c0_1] : memref<2x32x128xf32, #tpu.memory_space<vmem>>, vector<1x32x128xf32>
    %1 = vector.shape_cast %0 : vector<1x32x128xf32> to vector<32x128xf32>
    %c1 = arith.constant 1 : index
    %c0_2 = arith.constant 0 : index
    %c0_3 = arith.constant 0 : index
    %2 = vector.load %arg1[%c1, %c0_2, %c0_3] : memref<2x32x128xf32, #tpu.memory_space<vmem>>, vector<1x32x128xf32>
    %3 = vector.shape_cast %2 : vector<1x32x128xf32> to vector<32x128xf32>
    %c0_4 = arith.constant 0 : index
    %c0_5 = arith.constant 0 : index
    %4 = vector.load %arg2[%c0_4, %c0_5] : memref<32x128xi8, #tpu.memory_space<vmem>>, vector<32x128xi8>
    %5 = arith.extsi %4 : vector<32x128xi8> to vector<32x128xi32>
    %6 = arith.subf %3, %1 : vector<32x128xf32>
    %c1_i32 = arith.constant 1 : i32
    %7 = vector.broadcast %c1_i32 : i32 to vector<32x128xi32>
    %8 = arith.cmpi eq, %5, %7 : vector<32x128xi32>
    %cst = arith.constant 0.000000e+00 : f32
    %9 = vector.broadcast %cst : f32 to vector<32x128xf32>
    %10 = arith.subf %9, %6 : vector<32x128xf32>
    %11 = arith.select %8, %10, %6 : vector<32x128xi1>, vector<32x128xf32>
    %cst_6 = arith.constant 0.000000e+00 : f32
    %12 = vector.broadcast %cst_6 : f32 to vector<32x128xf32>
    %13 = arith.maximumf %11, %12 : vector<32x128xf32>
    %14 = math.absf %6 : vector<32x128xf32>
    %cst_7 = arith.constant 0.000000e+00 : f32
    %15 = vector.broadcast %cst_7 : f32 to vector<32x128xf32>
    %16 = arith.subf %15, %14 : vector<32x128xf32>
    %17 = math.exp %16 : vector<32x128xf32>
    %18 = math.log1p %17 : vector<32x128xf32>
    %19 = arith.addf %13, %18 : vector<32x128xf32>
    %cst_8 = arith.constant 0.666666686 : f32
    %cst_9 = arith.constant 0.333333343 : f32
    %20 = vector.broadcast %cst_8 : f32 to vector<32x128xf32>
    %21 = vector.broadcast %cst_9 : f32 to vector<32x128xf32>
    %22 = arith.select %8, %20, %21 : vector<32x128xi1>, vector<32x128xf32>
    %c32_i32 = arith.constant 32 : i32
    %23 = arith.muli %arg0, %c32_i32 : i32
    %24 = tpu.iota {dimensions = array<i32: 0>} : vector<32x1xi32>
    %25 = vector.broadcast %23 : i32 to vector<32x1xi32>
    %26 = arith.addi %25, %24 : vector<32x1xi32>
    %c32_i32_10 = arith.constant 32 : i32
    %27 = vector.broadcast %c32_i32_10 : i32 to vector<32x1xi32>
    %28 = arith.cmpi slt, %26, %27 : vector<32x1xi32>
    %29 = arith.mulf %22, %19 : vector<32x128xf32>
    %cst_11 = arith.constant 0.000000e+00 : f32
    %30 = vector.shape_cast %28 : vector<32x1xi1> to vector<32x1xi1>
    %31 = vector.broadcast %30 : vector<32x1xi1> to vector<32x128xi1>
    %32 = vector.broadcast %cst_11 : f32 to vector<32x128xf32>
    %33 = arith.select %31, %29, %32 : vector<32x128xi1>, vector<32x128xf32>
    %cst_12 = arith.constant dense<0.000000e+00> : vector<128xf32>
    %34 = vector.multi_reduction <add>, %33, %cst_12 [0] : vector<32x128xf32> to vector<128xf32>
    %35 = vector.shape_cast %34 : vector<128xf32> to vector<1x128xf32>
    %36 = tpu.iota {dimensions = array<i32: 0>} : vector<8x128xi32>
    %c0_i32 = arith.constant 0 : i32
    %37 = vector.broadcast %c0_i32 : i32 to vector<8x128xi32>
    %38 = arith.cmpi eq, %36, %37 : vector<8x128xi32>
    %cst_13 = arith.constant 0.000000e+00 : f32
    %39 = vector.shape_cast %35 : vector<1x128xf32> to vector<1x128xf32>
    %40 = vector.broadcast %39 : vector<1x128xf32> to vector<8x128xf32>
    %41 = vector.broadcast %cst_13 : f32 to vector<8x128xf32>
    %42 = arith.select %38, %40, %41 : vector<8x128xi1>, vector<8x128xf32>
    %c0_14 = arith.constant 0 : index
    %c0_15 = arith.constant 0 : index
    %43 = vector.load %arg3[%c0_14, %c0_15] : memref<8x128xf32, #tpu.memory_space<vmem>>, vector<8x128xf32>
    tpu.vector_store %arg3[%c0_14, %c0_15], %42 {strides = array<i32>} : memref<8x128xf32, #tpu.memory_space<vmem>>, vector<8x128xf32>,
    return
  }
  func.func @transform_0(%arg0: i32) -> (i32, i32, i32) {
    %c0_i32 = arith.constant 0 : i32
    %c0_i32_0 = arith.constant 0 : i32
    %c0_i32_1 = arith.constant 0 : i32
    return %c0_i32, %arg0, %c0_i32_0 : i32, i32, i32
  }
  func.func @transform_1(%arg0: i32) -> (i32, i32) {
    %c0_i32 = arith.constant 0 : i32
    %c0_i32_0 = arith.constant 0 : i32
    return %arg0, %c0_i32 : i32, i32
  }
  func.func @transform_2(%arg0: i32) -> (i32, i32) {
    %c0_i32 = arith.constant 0 : i32
    %c0_i32_0 = arith.constant 0 : i32
    return %arg0, %c0_i32 : i32, i32
  }
}

</mosaic_0001>

<bundles_post_ra>
// kernel: tpu_custom_call.1
= control target key start
LH: loop header
LB: loop body
LE: loop exit
PB: predicated region body
PF: predicated region fallthrough
CT: control target
= control target key end

     0   :  { %7 = vsyncpa [#allocation3], 0  ;;  %s386_s0 = inlined_call_operand.hbm [shape: f32[2,32,128], index: 0, kind: input, shape index: {}]   ;;  %s387_s1 = inlined_call_operand.hbm [shape: s8[32,128], index: 1, kind: input, shape index: {}]   ;;  %s388_s2 = inlined_call_operand.hbm [shape: f32[8,128], index: 2, kind: output, shape index: {}]  }
   0x1   :  { %8 = vsyncpa [#allocation6], 0 }
   0x2   :  { %9 = vsyncpa [#allocation4], 0  ;;  %s285_s9 = smov [#allocation2]   ;;  %s213_s13 = scalar_lea.hbm %s386_s0, 1024 }
   0x3   :  { %s15_s10 = sshll.u32 %s285_s9, 4  ;;  %p214_p0 = scmp.ne.s32.totalorder %s386_s0, %s213_s13  ;;  %s16_s10 = int_to_ptr.vmem [resolvable:$true] %s15_s10 }
   0x4   :  { %p217_p1 = scmp.lt.u32.totalorder %s213_s13, %s386_s0 }
   0x6   :  { %p219_p2 = pnand %p217_p1, %p214_p0 }
   0x8   :  { %222 = shalt.err (!%p219_p2)
}
   0x9   :  { %s223_s18 = scalar_lea.vmem %s16_s10, 1024  ;;  %p228_p4 = scmp.lt.s32.totalorder %s16_s10, %s16_s10 }
   0xa   :  { %p224_p3 = scmp.ne.s32.totalorder %s16_s10, %s223_s18  ;;  %p229_p5 = scmp.lt.s32.totalorder %s223_s18, %s223_s18 }
   0xc   :  { %p230_p6 = por %p229_p5, %p228_p4 }
   0xe   :  { %p231_p7 = pnand %p230_p6, %p224_p3 }
  0x10   :  { %234 = shalt.err (!%p231_p7)
}
  0x11   :  { %s286_s19 = smov 128   ;;  %s287_s20 = smov 8  }
  0x12   :  { %21 = dma.hbm_to_vmem [thread:$0]  %s386_s0, 1024, %s16_s10, [#allocation3], %s286_s19, %s286_s19, %s287_s20  }
  0x13   :  { %s288_s23 = smov [#allocation5]   ;;  %s235_s27 = scalar_lea.hbm %s387_s1, 128 }
  0x14   :  { %s28_s24 = sshll.u32 %s288_s23, 4  ;;  %p236_p8 = scmp.ne.s32.totalorder %s387_s1, %s235_s27  ;;  %s29_s24 = int_to_ptr.vmem [resolvable:$true] %s28_s24 }
  0x15   :  { %p239_p9 = scmp.lt.u32.totalorder %s235_s27, %s387_s1 }
  0x17   :  { %p241_p10 = pnand %p239_p9, %p236_p8 }
  0x19   :  { %244 = shalt.err (!%p241_p10)
}
  0x1a   :  { %s245_s4 = scalar_lea.vmem %s29_s24, 128  ;;  %p250_p12 = scmp.lt.s32.totalorder %s29_s24, %s29_s24 }
  0x1b   :  { %p246_p11 = scmp.ne.s32.totalorder %s29_s24, %s245_s4  ;;  %p251_p13 = scmp.lt.s32.totalorder %s245_s4, %s245_s4 }
  0x1d   :  { %p252_p0 = por %p251_p13, %p250_p12 }
  0x1f   :  { %p253_p1 = pnand %p252_p0, %p246_p11 }
  0x21   :  { %256 = shalt.err (!%p253_p1)
}
  0x22   :  { %31 = dma.hbm_to_vmem [thread:$0]  %s387_s1, 128, %s29_s24, [#allocation6]  }
  0x23   :  { %279 = dma.done.wait [#allocation3], 1024  }
  0x24   :  { %280 = vsyncadd [#allocation3], 4294966272 }
  0x25   :  { %281 = dma.done.wait [#allocation6], 128  }
  0x26   :  { %282 = vsyncadd [#allocation6], 4294967168  ;;  %v38_v0 = vld [vmem:[#allocation2] sm:$0xff]  ;;  %v39_v1 = vld [vmem:[#allocation2 + $0x8] sm:$0xff]  ;;  %s290_s1 = smov [#allocation7]  }
  0x27   :  { %v40_v2 = vld [vmem:[#allocation2 + $0x10] sm:$0xff]  ;;  %v41_v3 = vld [vmem:[#allocation2 + $0x18] sm:$0xff]  ;;  %v43_v4 = vld [vmem:[#allocation2 + $0x20] sm:$0xff]  ;;  %s181_s6 = sshll.u32 %s290_s1, 4  ;;  %s182_s6 = int_to_ptr.vmem [resolvable:$true] %s181_s6 }
  0x28   :  { %v44_v5 = vld [vmem:[#allocation2 + $0x28] sm:$0xff]  ;;  %v45_v6 = vld [vmem:[#allocation2 + $0x30] sm:$0xff]  ;;  %v46_v7 = vld [vmem:[#allocation2 + $0x38] sm:$0xff]  ;;  %v52_v8 = vsub.f32 %v43_v4, %v38_v0  ;;  %s257_s7 = scalar_lea.vmem %s182_s6, 128  ;;  %p262_p3 = scmp.lt.s32.totalorder %s182_s6, %s182_s6 }
  0x29   :  { %v53_v9 = vsub.f32 %v44_v5, %v39_v1  ;;  %v54_v10 = vsub.f32 %v45_v6, %v40_v2  ;;  %v55_v11 = vsub.f32 %v46_v7, %v41_v3  ;;  %v47_v25 = vld [vmem:[#allocation5] sm:$0xff]  ;;  %p258_p2 = scmp.ne.s32.totalorder %s182_s6, %s257_s7  ;;  %p263_p4 = scmp.lt.s32.totalorder %s257_s7, %s257_s7 }
  0x2a   :  { %v72_v12 = vand.u32 2147483647, %v52_v8  ;;  %v48_v31 = vunpack.c.0.s8 %v47_v25  ;;  %v49_v32 = vunpack.c.1.s8 %v47_v25  ;;  %v50_v34 = vunpack.c.2.s8 %v47_v25 }
  0x2b   :  { %v73_v13 = vand.u32 2147483647, %v53_v9  ;;  %v74_v14 = vand.u32 2147483647, %v54_v10  ;;  %v75_v15 = vand.u32 2147483647, %v55_v11  ;;  %v51_v36 = vunpack.c.3.s8 %v47_v25  ;;  %p264_p5 = por %p263_p4, %p262_p3 }
  0x2c   :  { %v76_v16 = vsub.f32 0.0, %v72_v12  ;;  %v60_v39 = vsub.f32 0.0, %v52_v8  ;;  %vm330_vm0 = vcmp.eq.s32.totalorder %v48_v31, 1  ;;  %vm334_vm1 = vcmp.eq.s32.totalorder %v49_v32, 1 }
  0x2d   :  { %v77_v17 = vsub.f32 0.0, %v73_v13  ;;  %v78_v18 = vsub.f32 0.0, %v74_v14  ;;  %v79_v19 = vsub.f32 0.0, %v75_v15  ;;  %v61_v43 = vsub.f32 0.0, %v53_v9  ;;  %p265_p6 = pnand %p264_p5, %p258_p2 }
  0x2e   :  { %v80_v20 = vmul.f32 1.442695, %v76_v16  ;;  %v62_v44 = vsub.f32 0.0, %v54_v10  ;;  %v63_v45 = vsub.f32 0.0, %v55_v11  ;;  %vm338_vm2 = vcmp.eq.s32.totalorder %v50_v34, 1 }
  0x2f   :  { %v82_v21 = vmul.f32 1.442695, %v77_v17  ;;  %v84_v22 = vmul.f32 1.442695, %v78_v18  ;;  %v86_v23 = vmul.f32 1.442695, %v79_v19  ;;  %v64_v52 = vsel %vm330_vm0, %v60_v39, %v52_v8 }
  0x30   :  { %197 = vpow2.f32 %v80_v20  ;;  %vm342_vm3 = vcmp.eq.s32.totalorder %v51_v36, 1  ;;  %v65_v55 = vsel %vm334_vm1, %v61_v43, %v53_v9  ;;  %v66_v57 = vsel %vm338_vm2, %v62_v44, %v54_v10 }
  0x31   :  { %199 = vpow2.f32 %v82_v21  ;;  %v67_v58 = vsel %vm342_vm3, %v63_v45, %v55_v11  ;;  %v68_v62 = vmax.f32 %v64_v52, 0.0  ;;  %v69_v3 = vmax.f32 %v65_v55, 0.0 }
  0x32   :  { %201 = vpow2.f32 %v84_v22  ;;  %v70_v8 = vmax.f32 %v66_v57, 0.0  ;;  %v71_v9 = vmax.f32 %v67_v58, 0.0  ;;  %v289_v14 = vmov 0.33333334  }
  0x33   :  { %203 = vpow2.f32 %v86_v23  ;;  %v128_v15 = vsel %vm330_vm0, 0.6666667, %v289_v14  ;;  %v129_v19 = vsel %vm334_vm1, 0.6666667, %v289_v14  ;;  %v130_v23 = vsel %vm338_vm2, 0.6666667, %v289_v14 }
  0x34   :  { %v133_v36 = vlaneseq }
  0x36   :  { %v134_v39 = vshrl.u32 %v133_v36, 7 }
  0x38   :  { %vm172_vm8 = vcmp.eq.s32.totalorder %v134_v39, 0 }
  0x3a   :  { %v198_v24 = vpop.eup %197 }
  0x3b   :  { %v200_v26 = vpop.eup %199  ;;  %v88_v27 = vadd.f32 1.0, %v198_v24  ;;  %v91_v35 = vmul.f32 -0.5, %v198_v24  ;;  %v94_v50 = vand.u32 2147483647, %v198_v24 }
  0x3c   :  { %v202_v28 = vpop.eup %201  ;;  %v97_v29 = vadd.f32 1.0, %v200_v26  ;;  %v100_v37 = vmul.f32 -0.5, %v200_v26  ;;  %v103_v53 = vand.u32 2147483647, %v200_v26 }
  0x3d   :  { %v204_v30 = vpop.eup %203  ;;  %205 = vlog2.f32 %v88_v27  ;;  %v106_v33 = vadd.f32 1.0, %v202_v28  ;;  %v109_v40 = vmul.f32 -0.5, %v202_v28  ;;  %v92_v46 = vadd.f32 1.0, %v91_v35 }
  0x3e   :  { %207 = vlog2.f32 %v97_v29  ;;  %v115_v38 = vadd.f32 1.0, %v204_v30  ;;  %v118_v47 = vmul.f32 -0.5, %v204_v30  ;;  %v101_v51 = vadd.f32 1.0, %v100_v37 }
  0x3f   :  { %209 = vlog2.f32 %v106_v33  ;;  %v110_v54 = vadd.f32 1.0, %v109_v40  ;;  %v112_v56 = vand.u32 2147483647, %v202_v28  ;;  %v93_v59 = vmul.f32 %v198_v24, %v92_v46 }
  0x40   :  { %211 = vlog2.f32 %v115_v38  ;;  %v119_v60 = vadd.f32 1.0, %v118_v47  ;;  %vm354_vm4 = vcmp.lt.f32.partialorder %v94_v50, 0.0004427343  ;;  %v102_v0 = vmul.f32 %v200_v26, %v101_v51 }
  0x41   :  { %v121_v1 = vand.u32 2147483647, %v204_v30  ;;  %vm358_vm5 = vcmp.lt.f32.partialorder %v103_v53, 0.0004427343  ;;  %v111_v6 = vmul.f32 %v202_v28, %v110_v54  ;;  %vm113_vm6 = vcmp.lt.f32.partialorder %v112_v56, 0.0004427343 }
  0x42   :  { %v120_v13 = vmul.f32 %v204_v30, %v119_v60  ;;  %v131_v27 = vsel %vm342_vm3, 0.6666667, %v289_v14 }
  0x43   :  { %vm122_vm7 = vcmp.lt.f32.partialorder %v121_v1, 0.0004427343 }
  0x47   :  { %v206_v61 = vpop.eup %205 }
  0x48   :  { %v208_v2 = vpop.eup %207  ;;  %v90_v4 = vmul.f32 0.6931472, %v206_v61 }
  0x49   :  { %v210_v7 = vpop.eup %209  ;;  %v99_v10 = vmul.f32 0.6931472, %v208_v2 }
  0x4a   :  { %v96_v11 = vsel %vm354_vm4, %v93_v59, %v90_v4  ;;  %v108_v12 = vmul.f32 0.6931472, %v210_v7  ;;  %v212_v16 = vpop.eup %211 }
  0x4b   :  { %v105_v17 = vsel %vm358_vm5, %v102_v0, %v99_v10  ;;  %v124_v18 = vadd.f32 %v96_v11, %v68_v62  ;;  %v117_v21 = vmul.f32 0.6931472, %v212_v16 }
  0x4c   :  { %v114_v20 = vsel %vm113_vm6, %v111_v6, %v108_v12  ;;  %v125_v22 = vadd.f32 %v105_v17, %v69_v3 }
  0x4d   :  { %v126_v24 = vadd.f32 %v114_v20, %v70_v8  ;;  %v147_v25 = vmul.f32 %v128_v15, %v124_v18  ;;  %v123_v26 = vsel %vm122_vm7, %v120_v13, %v117_v21 }
  0x4e   :  { %v148_v28 = vmul.f32 %v129_v19, %v125_v22  ;;  %v127_v29 = vadd.f32 %v123_v26, %v71_v9 }
  0x4f   :  { %v149_v30 = vmul.f32 %v130_v23, %v126_v24 }
  0x50   :  { %v163_v31 = vadd.f32 %v148_v28, %v147_v25  ;;  %v150_v32 = vmul.f32 %v131_v27, %v127_v29 }
  0x52   :  { %v164_v33 = vadd.f32 %v163_v31, %v149_v30 }
  0x54   :  { %v165_v34 = vadd.f32 %v164_v33, %v150_v32 }
  0x56   :  { %v166_v35 = vrot.slane %v165_v34, 4 }
  0x58   :  { %v167_v37 = vadd.f32 %v166_v35, %v165_v34 }
  0x5a   :  { %v168_v38 = vrot.slane %v167_v37, 2 }
  0x5c   :  { %v169_v40 = vadd.f32 %v168_v38, %v167_v37 }
  0x5e   :  { %v170_v41 = vrot.slane %v169_v40, 1 }
  0x60   :  { %v171_v42 = vadd.f32 %v170_v41, %v169_v40 }
  0x62   :  { %v173_v43 = vsel %vm172_vm8, %v171_v42, 0.0 }
  0x63   :  { %174 = vst [vmem:[#allocation7] sm:$0xff] %v173_v43 }
  0x64   :  { %268 = shalt.err (!%p265_p6)
}
  0x65   :  { %s269_s10 = scalar_lea.hbm %s388_s2, 128 }
  0x66   :  { %p270_p7 = scmp.ne.s32.totalorder %s388_s2, %s269_s10  ;;  %p273_p8 = scmp.lt.u32.totalorder %s269_s10, %s388_s2 }
  0x68   :  { %p275_p9 = pnand %p273_p8, %p270_p7 }
  0x6a   :  { %278 = shalt.err (!%p275_p9)
}
  0x6b   :  { %184 = dma.vmem_to_hbm [thread:$0]  %s182_s6, 128, %s388_s2, [#allocation4]  }
  0x6c   :  { %283 = dma.done.wait [#allocation4], 128  }
  0x6d   :  { %284 = vsyncadd [#allocation4], 4294967168 }
  0x6e   :  { %188 = vsyncpa [#allocation3], 1 }
  0x6f   :  { %189 = vsyncpa [#allocation6], 1 }
  0x70   :  { %190 = vsyncpa [#allocation4], 1 }

</bundles_post_ra>
